<compile_context>
chip_gen: v7x
topology: tpu7x:2x2x1
jax: 0.10.0
libtpu: 0.0.40
codegen_flags: <defaults>
</compile_context>

<pallas_src>
import jax
import jax.numpy as jnp
from jax import lax
from jax.experimental import pallas as pl
from jax.experimental.pallas import tpu as pltpu


def _round_up(a, m):
    return ((a + m - 1) // m) * m


def _make_mlp_kernel(n_layers, chunk_b, n_chunks):
    """Kernel over one batch tile.

    x_ref:  (tile_b, in_size)   batch-major input block (one contiguous DMA)
    refs:   W_0, b_0, ..., W_{L-1}, b_{L-1}, o_ref
            W_l: (fan_out, fan_in), b_l: (fan_out, 1)
    o_ref:  (out_size, tile_b)  feature-major, lane-dense output block
    """

    def kernel(x_ref, *refs):
        o_ref = refs[-1]
        # Hoist the tiny weight/bias loads out of the chunk loop (a few vregs;
        # JAX does not CSE repeated ref loads inside an unrolled loop).
        ws = [refs[2 * l][...] for l in range(n_layers)]
        bs = [refs[2 * l + 1][...] for l in range(n_layers)]

        def sigmoid(z):
            # exp goes to the EUP; exact reciprocal keeps the kernel within
            # ~1e-7 of the f32 reference.  (approx=True is a free micro-win if
            # ~1e-4 relative error is acceptable.)
            return pl.reciprocal(1.0 + jnp.exp(-z), approx=False)

        def chunk_body(c, carry):
            start = pl.multiple_of(c * chunk_b, chunk_b)
            xc = x_ref[pl.ds(start, chunk_b), :]          # (chunk_b, in_size)

            # Layer 1: contract dim 1 of both operands -> (fan_out, chunk_b).
            # This performs the batch-major -> feature-major flip on the MXU,
            # putting the batch on the lane axis for the rest of the layers.
            z = lax.dot_general(
                ws[0], xc,
                dimension_numbers=(((1,), (1,)), ((), ())),
                preferred_element_type=jnp.float32) + bs[0]
            h = jnp.maximum(z, 0.0) if n_layers > 1 else sigmoid(z)

            for l in range(1, n_layers):
                z = jnp.dot(ws[l], h,
                            preferred_element_type=jnp.float32) + bs[l]
                if l < n_layers - 1:
                    h = jnp.maximum(z, 0.0)               # ReLU
                else:
                    h = sigmoid(z)

            o_ref[:, pl.ds(start, chunk_b)] = h.astype(o_ref.dtype)
            return carry

        # Short fixed trip count -> fully unrolled for LLO scheduler visibility.
        lax.fori_loop(0, n_chunks, chunk_body, 0, unroll=True)

    return kernel


def lj8_3_forward(x, params, *, tile_b=4096, chunk_b=512):
    """Forward pass matching LJ8_3.forward.

    x:      (B, in_size) float32, PyTorch-style batch-major input.
    params: list of (W, b) with W: (fan_out, fan_in) (native nn.Linear layout)
            and b: (fan_out, 1).
    Returns (B, out_size) float32.
    """
    B, in_size = x.shape
    n_layers = len(params)
    out_size = params[-1][0].shape[0]

    x = x.astype(jnp.float32)

    # --- batch tiling -----------------------------------------------------
    # Lane-dense tiles (multiples of 128); big tiles amortize per-step
    # pipeline overhead.  VMEM stays trivial: even tile_b=8192 is ~0.75 MiB
    # for the x block (1.5 MiB double-buffered) + small per-chunk activations.
    tile_b = max(128, _round_up(int(tile_b), 128))
    # Don't over-pad tiny batches.
    tile_b = min(tile_b, _round_up(B, 128))
    # Keep >= 2 grid steps when the batch allows it, so the "parallel" batch
    # axis can shard across v7x's two TensorCores.
    tile_b = min(tile_b, max(128, _round_up(pl.cdiv(B, 2), 128)))
    # In-kernel strip-mine size; tile_b must be a multiple of it.
    chunk_b = max(128, min(_round_up(int(chunk_b), 128), tile_b))
    tile_b = _round_up(tile_b, chunk_b)
    n_chunks = tile_b // chunk_b

    num_tiles = pl.cdiv(B, tile_b)
    b_pad = num_tiles * tile_b  # output padded; edge x block reads are clamped

    grid = (num_tiles,)

    # x: batch-major, one contiguous (tile_b, in_size) slab per grid step.
    in_specs = [pl.BlockSpec((tile_b, in_size), lambda i: (i, 0))]
    flat_args = [x]
    for w, b in params:
        # Small weight/bias full-array blocks, same block every grid step
        # (held resident across the batch grid).
        in_specs.append(pl.BlockSpec(w.shape, lambda i: (0, 0)))
        in_specs.append(pl.BlockSpec(b.shape, lambda i: (0, 0)))
        flat_args.append(w.astype(jnp.float32))
        flat_args.append(b.astype(jnp.float32))

    out_t = pl.pallas_call(
        _make_mlp_kernel(n_layers, chunk_b, n_chunks),
        out_shape=jax.ShapeDtypeStruct((out_size, b_pad), jnp.float32),
        grid_spec=pltpu.PrefetchScalarGridSpec(
            num_scalar_prefetch=0,
            grid=grid,
            in_specs=in_specs,
            out_specs=pl.BlockSpec((out_size, tile_b), lambda i: (0, i)),
        ),
        # Footprint is far under the default scoped-VMEM limit on
        # v5e (16 MiB) / v6e / v7x (32 MiB): no vmem_limit_bytes needed.
        compiler_params=pltpu.CompilerParams(
            dimension_semantics=("parallel",)),
    )(*flat_args)

    # Lane-dense (out_size, b_pad) -> PyTorch (B, out_size).  Output is tiny
    # (B*out_size floats), so this layout plumbing is negligible.
    return jnp.transpose(out_t[:, :B])


def init_params(key, in_size, hidden_sizes, out_size):
    """Deterministic init mimicking PyTorch Linear default U[-1/sqrt(fan_in), +].

    Weights in native PyTorch layout (fan_out, fan_in); biases (fan_out, 1).
    """
    sizes = [in_size] + list(hidden_sizes) + [out_size]
    params = []
    for fan_in, fan_out in zip(sizes[:-1], sizes[1:]):
        key, kw, kb = jax.random.split(key, 3)
        bound = 1.0 / jnp.sqrt(fan_in)
        w = jax.random.uniform(kw, (fan_out, fan_in), jnp.float32, -bound, bound)
        b = jax.random.uniform(kb, (fan_out, 1), jnp.float32, -bound, bound)
        params.append((w, b))
    return params


def reference_forward(x, params):
    h = x
    for w, b in params[:-1]:
        h = jnp.maximum(h @ w.T + b.T, 0.0)
    w, b = params[-1]
    return jax.nn.sigmoid(h @ w.T + b.T)


if __name__ == "__main__":
    # LJ8 in 3D: 8 atoms * 3 coords = 24 input features; two hidden layers;
    # scalar committor output.  Batch chosen so the default tiling produces
    # multiple grid steps AND a ragged edge block (exercises the no-pad path).
    in_size, hidden_sizes, out_size = 24, [32, 32], 1
    batch = 200

    key = jax.random.PRNGKey(0)
    kx, kp = jax.random.split(key)
    x = jax.random.normal(kx, (batch, in_size), jnp.float32)
    params = init_params(kp, in_size, hidden_sizes, out_size)

    out = lj8_3_forward(x, params)
    out = jax.block_until_ready(out)

    ref = reference_forward(x, params)
    assert out.shape == (batch, out_size)
    assert bool(jnp.all(jnp.isfinite(out)))
    assert jnp.allclose(out, ref, atol=1e-5, rtol=1e-5), \
        float(jnp.max(jnp.abs(out - ref)))
    print("KERNEL_OK")
</pallas_src>

<mosaic_0001>
module attributes {stable_mosaic.version = 11 : i64} {
  func.func @kernel(%arg0: i32, %arg1: memref<128x24xf32, #tpu.memory_space<vmem>>, %arg2: memref<32x24xf32, #tpu.memory_space<vmem>>, %arg3: memref<32x1xf32, #tpu.memory_space<vmem>>, %arg4: memref<32x32xf32, #tpu.memory_space<vmem>>, %arg5: memref<32x1xf32, #tpu.memory_space<vmem>>, %arg6: memref<1x32xf32, #tpu.memory_space<vmem>>, %arg7: memref<1x1xf32, #tpu.memory_space<vmem>>, %arg8: memref<1x128xf32, #tpu.memory_space<vmem>>) attributes {dimension_semantics = [#tpu.dimension_semantics<parallel>], iteration_bounds = array<i64: 2>, scalar_prefetch = 0 : i64, scratch_operands = 0 : i64, tpu.core_type = #tpu.core_type<tc>, window_params = [{transform_indices = @transform_0, window_bounds = array<i64: 128, 24>}, {pipeline_mode = #tpu.pipeline_mode<synchronous>, transform_indices = @transform_1, window_bounds = array<i64: 32, 24>}, {pipeline_mode = #tpu.pipeline_mode<synchronous>, transform_indices = @transform_2, window_bounds = array<i64: 32, 1>}, {pipeline_mode = #tpu.pipeline_mode<synchronous>, transform_indices = @transform_3, window_bounds = array<i64: 32, 32>}, {pipeline_mode = #tpu.pipeline_mode<synchronous>, transform_indices = @transform_4, window_bounds = array<i64: 32, 1>}, {pipeline_mode = #tpu.pipeline_mode<synchronous>, transform_indices = @transform_5, window_bounds = array<i64: 1, 32>}, {pipeline_mode = #tpu.pipeline_mode<synchronous>, transform_indices = @transform_6, window_bounds = array<i64: 1, 1>}, {transform_indices = @transform_7, window_bounds = array<i64: 1, 128>}]} {
    %c0 = arith.constant 0 : index
    %c0_0 = arith.constant 0 : index
    %0 = vector.load %arg2[%c0, %c0_0] : memref<32x24xf32, #tpu.memory_space<vmem>>, vector<32x24xf32>
    %c0_1 = arith.constant 0 : index
    %c0_2 = arith.constant 0 : index
    %1 = vector.load %arg4[%c0_1, %c0_2] : memref<32x32xf32, #tpu.memory_space<vmem>>, vector<32x32xf32>
    %c0_3 = arith.constant 0 : index
    %c0_4 = arith.constant 0 : index
    %2 = vector.load %arg6[%c0_3, %c0_4] : memref<1x32xf32, #tpu.memory_space<vmem>>, vector<1x32xf32>
    %c0_5 = arith.constant 0 : index
    %c0_6 = arith.constant 0 : index
    %3 = vector.load %arg3[%c0_5, %c0_6] : memref<32x1xf32, #tpu.memory_space<vmem>>, vector<32x1xf32>
    %c0_7 = arith.constant 0 : index
    %c0_8 = arith.constant 0 : index
    %4 = vector.load %arg5[%c0_7, %c0_8] : memref<32x1xf32, #tpu.memory_space<vmem>>, vector<32x1xf32>
    %c0_9 = arith.constant 0 : index
    %c0_10 = arith.constant 0 : index
    %5 = vector.load %arg7[%c0_9, %c0_10] : memref<1x1xf32, #tpu.memory_space<vmem>>, vector<1x1xf32>
    %c0_i32 = arith.constant 0 : i32
    %c128_i32 = arith.constant 128 : i32
    %6 = arith.muli %c0_i32, %c128_i32 : i32
    %7 = tpu.assume_multiple %6, 128 : i32
    %8 = arith.index_cast %7 : i32 to index
    %c0_11 = arith.constant 0 : index
    %9 = vector.load %arg1[%8, %c0_11] : memref<128x24xf32, #tpu.memory_space<vmem>>, vector<128x24xf32>
    %cst = arith.constant dense<0.000000e+00> : vector<32x128xf32>
    %10 = tpu.matmul %0, %9, %cst {dimension_numbers = #tpu.dot_dimension_numbers<[1], [1], [0], [0], [0, 0, 1, 0], [], []>} : vector<32x24xf32>, vector<128x24xf32>, vector<32x128xf32> -> vector<32x128xf32>
    %11 = vector.broadcast %3 : vector<32x1xf32> to vector<32x128xf32>
    %12 = arith.addf %10, %11 : vector<32x128xf32>
    %cst_12 = arith.constant 0.000000e+00 : f32
    %13 = vector.broadcast %cst_12 : f32 to vector<32x128xf32>
    %14 = arith.maximumf %12, %13 : vector<32x128xf32>
    %cst_13 = arith.constant dense<0.000000e+00> : vector<32x128xf32>
    %15 = tpu.matmul %1, %14, %cst_13 {dimension_numbers = #tpu.dot_dimension_numbers<[1], [0], [0], [1], [0, 0, 1, 1], [], []>} : vector<32x32xf32>, vector<32x128xf32>, vector<32x128xf32> -> vector<32x128xf32>
    %16 = vector.broadcast %4 : vector<32x1xf32> to vector<32x128xf32>
    %17 = arith.addf %15, %16 : vector<32x128xf32>
    %cst_14 = arith.constant 0.000000e+00 : f32
    %18 = vector.broadcast %cst_14 : f32 to vector<32x128xf32>
    %19 = arith.maximumf %17, %18 : vector<32x128xf32>
    %cst_15 = arith.constant dense<0.000000e+00> : vector<1x128xf32>
    %20 = tpu.matmul %2, %19, %cst_15 {dimension_numbers = #tpu.dot_dimension_numbers<[1], [0], [0], [1], [0, 0, 1, 1], [], []>} : vector<1x32xf32>, vector<32x128xf32>, vector<1x128xf32> -> vector<1x128xf32>
    %21 = vector.broadcast %5 : vector<1x1xf32> to vector<1x128xf32>
    %22 = arith.addf %20, %21 : vector<1x128xf32>
    %cst_16 = arith.constant 0.000000e+00 : f32
    %23 = vector.broadcast %cst_16 : f32 to vector<1x128xf32>
    %24 = arith.subf %23, %22 : vector<1x128xf32>
    %25 = math.exp %24 : vector<1x128xf32>
    %cst_17 = arith.constant 1.000000e+00 : f32
    %26 = vector.broadcast %cst_17 : f32 to vector<1x128xf32>
    %27 = arith.addf %26, %25 : vector<1x128xf32>
    %28 = tpu.reciprocal %27 : vector<1x128xf32> -> vector<1x128xf32>
    %c0_18 = arith.constant 0 : index
    %29 = arith.index_cast %7 : i32 to index
    %30 = vector.load %arg8[%c0_18, %29] : memref<1x128xf32, #tpu.memory_space<vmem>>, vector<1x128xf32>
    tpu.vector_store %arg8[%c0_18, %29], %28 {strides = array<i32>} : memref<1x128xf32, #tpu.memory_space<vmem>>, vector<1x128xf32>,
    %c1_i32 = arith.constant 1 : i32
    return
  }
  func.func @transform_0(%arg0: i32) -> (i32, i32) {
    %c0_i32 = arith.constant 0 : i32
    %c0_i32_0 = arith.constant 0 : i32
    return %arg0, %c0_i32 : i32, i32
  }
  func.func @transform_1(%arg0: i32) -> (i32, i32) {
    %c0_i32 = arith.constant 0 : i32
    %c0_i32_0 = arith.constant 0 : i32
    %c0_i32_1 = arith.constant 0 : i32
    return %c0_i32, %c0_i32_0 : i32, i32
  }
  func.func @transform_2(%arg0: i32) -> (i32, i32) {
    %c0_i32 = arith.constant 0 : i32
    %c0_i32_0 = arith.constant 0 : i32
    %c0_i32_1 = arith.constant 0 : i32
    return %c0_i32, %c0_i32_0 : i32, i32
  }
  func.func @transform_3(%arg0: i32) -> (i32, i32) {
    %c0_i32 = arith.constant 0 : i32
    %c0_i32_0 = arith.constant 0 : i32
    %c0_i32_1 = arith.constant 0 : i32
    return %c0_i32, %c0_i32_0 : i32, i32
  }
  func.func @transform_4(%arg0: i32) -> (i32, i32) {
    %c0_i32 = arith.constant 0 : i32
    %c0_i32_0 = arith.constant 0 : i32
    %c0_i32_1 = arith.constant 0 : i32
    return %c0_i32, %c0_i32_0 : i32, i32
  }
  func.func @transform_5(%arg0: i32) -> (i32, i32) {
    %c0_i32 = arith.constant 0 : i32
    %c0_i32_0 = arith.constant 0 : i32
    %c0_i32_1 = arith.constant 0 : i32
    return %c0_i32, %c0_i32_0 : i32, i32
  }
  func.func @transform_6(%arg0: i32) -> (i32, i32) {
    %c0_i32 = arith.constant 0 : i32
    %c0_i32_0 = arith.constant 0 : i32
    %c0_i32_1 = arith.constant 0 : i32
    return %c0_i32, %c0_i32_0 : i32, i32
  }
  func.func @transform_7(%arg0: i32) -> (i32, i32) {
    %c0_i32 = arith.constant 0 : i32
    %c0_i32_0 = arith.constant 0 : i32
    return %c0_i32, %arg0 : i32, i32
  }
}

</mosaic_0001>

<bundles_post_ra>
// kernel: tpu_custom_call.1
= control target key start
LH: loop header
LB: loop body
LE: loop exit
PB: predicated region body
PF: predicated region fallthrough
CT: control target
= control target key end

     0   :  { %s1350_s0 = inlined_call_operand.vmem [shape: f32[200,24], index: 0, kind: input, shape index: {}]   ;;  %s1351_s1 = inlined_call_operand.vmem [shape: f32[32,24], index: 1, kind: input, shape index: {}]   ;;  %s1352_s2 = inlined_call_operand.vmem [shape: f32[32,1], index: 2, kind: input, shape index: {}]   ;;  %s1353_s3 = inlined_call_operand.vmem [shape: f32[32,32], index: 3, kind: input, shape index: {}]   ;;  %s1354_s4 = inlined_call_operand.vmem [shape: f32[32,1], index: 4, kind: input, shape index: {}]   ;;  %s1355_s5 = inlined_call_operand.vmem [shape: f32[1,32], index: 5, kind: input, shape index: {}]   ;;  %s1356_s6 = inlined_call_operand.<no memory space> [shape: f32[1,1], index: 6, kind: input, shape index: {}]   ;;  %s1357_s7 = inlined_call_operand.hbm [shape: f32[1,256], index: 7, kind: output, shape index: {}]  }
   0x1   :  { %v12_v0 = vstv %s1356_s6 }
   0x2   :  { %13 = vst [vmem:[#allocation2] sm:$0x1] %v12_v0 }
   0x3   :  { %14 = vsyncpa [#allocation4], 0 }
   0x4   :  { %16 = vsyncpa [#allocation4 + $0x1], 0  ;;  %s1135_s26 = smov 0   ;;  %s1137_s27 = smov 0  }
   0x5   :  { %s1139_s28 = smov 0   ;;  %s1141_s29 = smov 0  }
   0x6 LB: > { %s781_s6 = sadd.s32 4294967295, %s1085_s29   ;;  %s782_s30 = sadd.s32 4294967294, %s1085_s29   ;;  %s1085_s29 = sphi %s1141_s29, %s1365_s29   ;;  %s1081_s28 = sphi %s1139_s28, %s1364_s28   ;;  %s1077_s27 = sphi %s1137_s27, %s1363_s27   ;;  %s1073_s26 = sphi %s1135_s26, %s1362_s26  }
   0x7   : > { %s1158_s8 = sadd.s32 1, %s1085_s29   ;;  %s181_s9 = sadd.s32 1, %s1081_s28 }
   0x8   : > { %s178_s10 = ssub.s32 %s1085_s29, %s1158_s8  ;;  %p191_p0 = scmp.ne.s32.totalorder %s1081_s28, %s1077_s27 }
   0x9   : > { %p179_p1 = scmp.eq.s32.totalorder %s178_s10, 0  ;;  %p192_p2 = scmp.eq.s32.totalorder %s781_s6, 1 }
   0xa   : > { %p197_p3 = scmp.ne.s32.totalorder %s1077_s27, %s1073_s26  ;;  %p198_p4 = scmp.eq.s32.totalorder %s782_s30, 1 }
   0xb   : > { %s1168_s11 = scalar_select %p179_p1, %s1081_s28, %s181_s9  }
   0xc   : > { %p1170_p5 = por %p192_p2, %p191_p0  ;;  %p1174_p6 = por %p198_p4, %p197_p3 }
   0xd   : > { %p785_p7 = scmp.ge.s32.totalorder %s1085_s29, 1  ;;  %p251_p8 = scmp.lt.s32.totalorder %s1085_s29, 3 }
   0xf   : > { %p252_p9 = pnand %p785_p7, %p251_p8 }
  0x10   : > { %s1180_s14 = sshll.u32 (!%p252_p9), %s781_s6, 4  ;;  %vm354_vm0 = vcmask (!%p252_p9), 195584   ;;  %v300_v1 = vld [vmem:[%s1351_s1] sm:$0xff] (!%p252_p9)  ;;  %v1087_v2 = vmov (!%p252_p9), 0   ;;  %v311_v4 = vld [vmem:[%s1352_s2 + $0x10] sm:$0xff] (!%p252_p9)  ;;  %v310_v5 = vld [vmem:[%s1352_s2 + $0x8] sm:$0xff] (!%p252_p9) }
  0x11   : > { %255 = sbr.rel (%p252_p9) target bundleno = 804 (0x324), region = 48  ;;  %p291_p10 = scmp.lt.s32.totalorder (!%p252_p9), %s1180_s14, 24  ;;  %881 = vmatprep.mubr.msk.f32.mxu0 (!%p252_p9), %vm354_vm0, %v300_v1  ;;  %1017 = vset.pattern.permute.xlu0 (!%p252_p9), %v1087_v2  ;;  %v309_v3 = vld [vmem:[%s1352_s2] sm:$0xff] (!%p252_p9)  ;;  %v312_v6 = vld [vmem:[%s1352_s2 + $0x18] sm:$0xff] (!%p252_p9)  ;;  %vm1207_vm1 = vmpackc.low (!%p252_p9), %vm354_vm0, %vm354_vm0  ;;  %vm524_vm2 = vcmask (!%p252_p9), 261120   ;;  %v1088_v62 = vmov (!%p252_p9), 0.0|0.0  }
  0x12   : > { %336 = vperm.xlu0 (!%p252_p9), %1017, %v309_v3   ;;  %1018 = vset.pattern.permute.xlu1 (!%p252_p9), %v1087_v2  ;;  %v313_v8 = vld [vmem:[%s1354_s4] sm:$0xff] (!%p252_p9)  ;;  %v314_v14 = vld [vmem:[%s1354_s4 + $0x8] sm:$0xff] (!%p252_p9)  ;;  %v315_v16 = vld [vmem:[%s1354_s4 + $0x10] sm:$0xff] (!%p252_p9)  ;;  %vm1089_vm3 = vmmov (!%p252_p9), 0   ;;  %v1090_v63 = vmov (!%p252_p9), 0.0   ;;  %s284_s24 = sand.u32 (!%p252_p9), 1, %s1077_s27  }
  0x13   : > { %346 = vperm.xlu1 (!%p252_p9), %1018, %v311_v4   ;;  %v316_v17 = vld [vmem:[%s1354_s4 + $0x18] sm:$0xff] (!%p252_p9)  ;;  %v317_v20 = vld [vmem:[#allocation2] sm:$0x1] (!%p252_p9)  ;;  %v301_v37 = vld [vmem:[%s1351_s1 + $0x8] sm:$0xff] (!%p252_p9)  ;;  %s285_s25 = scalar_lea.vmem (!%p252_p9), [#allocation3], %s284_s24  ;;  %s715_s15 = scalar_lea.sflag (!%p252_p9), [#allocation4], %s284_s24 }
  0x14   : > { %v302_v38 = vld [vmem:[%s1351_s1 + $0x10] sm:$0xff] (!%p252_p9)  ;;  %v303_v39 = vld [vmem:[%s1351_s1 + $0x18] sm:$0xff] (!%p252_p9)  ;;  %v304_v40 = vld [vmem:[%s1353_s3] sm:$0xff] (!%p252_p9)  ;;  %s1091_s17 = smov (!%p252_p9), [#allocation3]  }
  0x15   : > { %895 = vmatprep.mubr.msk.f32.mxu1 (!%p252_p9), %vm524_vm2, %v304_v40  ;;  %v305_v59 = vld [vmem:[%s1353_s3 + $0x8] sm:$0xff] (!%p252_p9)  ;;  %v306_v60 = vld [vmem:[%s1353_s3 + $0x10] sm:$0xff] (!%p252_p9)  ;;  %v307_v61 = vld [vmem:[%s1353_s3 + $0x18] sm:$0xff] (!%p252_p9)  ;;  %s1027_s18 = sshll.u32 (!%p252_p9), %s1091_s17, 4  ;;  %s1028_s18 = int_to_ptr.vmem [resolvable:$false] %s1027_s18 }
  0x16   : > { %341 = vperm.xlu0 (!%p252_p9), %1017, %v310_v5   ;;  %s1029_s19 = scalar_lea.vmem (!%p252_p9), %s1028_s18, 32 }
  0x17   : > { %351 = vperm.xlu1 (!%p252_p9), %1018, %v312_v6  }
  0x18   : > { %s292_s21 = scalar_select %p291_p10, %s1180_s14, 24 }
  0x1a   : > { %s787_s6 = sshll.u32 %s292_s21, 3  ;;  %506 = vperm.xlu0 %1017, %v313_v8  }
  0x1b   : > { %s1203_s10 = scalar_lea.vmem %s1350_s0, %s787_s6  ;;  %511 = vperm.xlu1 %1018, %v314_v14   ;;  %s727_s6 = sshll.u32 %s285_s25, 4  ;;  %s1310_s6 = int_to_ptr.vmem [resolvable:$true] %s727_s6 }
  0x1c   : > { %v318_v9 = vld [vmem:[%s1203_s10] sm:$0xff]  ;;  %v319_v10 = vld [vmem:[%s1203_s10 + $0x8] sm:$0xff]  ;;  %v320_v11 = vld [vmem:[%s1203_s10 + $0x10] sm:$0xff]  ;;  %s1023_s16 = scalar_lea.vmem %s1310_s6, 16  ;;  %p1030_p0 = scmp.lt.s32.totalorder %s1310_s6, %s1028_s18 }
  0x1d   : > { %v912_v12 = vpack.c.bf16 %v319_v10, %v318_v9  ;;  %v321_v13 = vld [vmem:[%s1203_s10 + $0x18] sm:$0xff]  ;;  %v322_v18 = vld [vmem:[%s1203_s10 + $0x20] sm:$0xff]  ;;  %v323_v19 = vld [vmem:[%s1203_s10 + $0x28] sm:$0xff]  ;;  %p1024_p11 = scmp.ne.s32.totalorder %s1310_s6, %s1023_s16  ;;  %p1031_p1 = scmp.lt.s32.totalorder %s1029_s19, %s1023_s16 }
  0x1e   : > { %v918_v15 = vpack.c.bf16 %v321_v13, %v320_v11  ;;  %516 = vperm.xlu0 %1017, %v315_v16   ;;  %v924_v21 = vpack.c.bf16 %v323_v19, %v322_v18  ;;  %v324_v22 = vld [vmem:[%s1203_s10 + $0x30] sm:$0xff]  ;;  %v325_v23 = vld [vmem:[%s1203_s10 + $0x38] sm:$0xff]  ;;  %v326_v25 = vld [vmem:[%s1203_s10 + $0x40] sm:$0xff]  ;;  %v631_v19 = vlaneseq }
  0x1f   : > { %914 = vmatprep.subr.msk.bf16.mxu0 %vm1207_vm1, %v912_v12  ;;  %521 = vperm.xlu1 %1018, %v316_v17   ;;  %v930_v24 = vpack.c.bf16 %v325_v23, %v324_v22  ;;  %v327_v26 = vld [vmem:[%s1203_s10 + $0x48] sm:$0xff]  ;;  %v328_v28 = vld [vmem:[%s1203_s10 + $0x50] sm:$0xff]  ;;  %v329_v29 = vld [vmem:[%s1203_s10 + $0x58] sm:$0xff]  ;;  %p1025_p12 = pnand %p1024_p11, %p1170_p5  ;;  %p1032_p2 = por %p1031_p1, %p1030_p0 }
  0x20   : > { %917 = vmatpush3.bf16.xpose.msk.msra.mxu0 %vm1207_vm1, %v912_v12  ;;  %v936_v27 = vpack.c.bf16 %v327_v26, %v326_v25  ;;  %v942_v30 = vpack.c.bf16 %v329_v29, %v328_v28  ;;  %v330_v31 = vld [vmem:[%s1203_s10 + $0x60] sm:$0xff]  ;;  %v331_v32 = vld [vmem:[%s1203_s10 + $0x68] sm:$0xff]  ;;  %v332_v34 = vld [vmem:[%s1203_s10 + $0x70] sm:$0xff] }
  0x21   : > { %920 = vmatprep.subr.msk.bf16.mxu0 %vm1207_vm1, %v918_v15  ;;  %v948_v33 = vpack.c.bf16 %v331_v32, %v330_v31  ;;  %v333_v35 = vld [vmem:[%s1203_s10 + $0x78] sm:$0xff]  ;;  %v308_v18 = vld [vmem:[%s1355_s5] sm:$0x1]  ;;  %s1308_s10 = scalar_lea.hbm %s1357_s7, %s1180_s14  ;;  %p1026_p13 = pneg %p1025_p12 }
  0x22   : > { %628 = vperm.xlu0 %1017, %v317_v20   ;;  %v954_v36 = vpack.c.bf16 %v333_v35, %v332_v34  ;;  %v632_v20 = vshrl.u32 %v631_v19, 7 }
  0x23   : > { %p1033_p3 = pnand %p1032_p2, %p1026_p13 }
  0x28   : > { %923 = vmatpush3.bf16.xpose.msk.msra.mxu0 %vm1207_vm1, %v918_v15 }
  0x29   : > { %926 = vmatprep.subr.msk.bf16.mxu0 %vm1207_vm1, %v924_v21 }
  0x30   : > { %929 = vmatpush3.bf16.xpose.msk.msra.mxu0 %vm1207_vm1, %v924_v21  ;;  %v633_v21 = vsub.s32 0, %v632_v20 }
  0x31   : > { %932 = vmatprep.subr.msk.bf16.mxu0 %vm1207_vm1, %v930_v24 }
  0x38   : > { %935 = vmatpush3.bf16.xpose.msk.msra.mxu0 %vm1207_vm1, %v930_v24 }
  0x39   : > { %938 = vmatprep.subr.msk.bf16.mxu0 %vm1207_vm1, %v936_v27 }
  0x40   : > { %941 = vmatpush3.bf16.xpose.msk.msra.mxu0 %vm1207_vm1, %v936_v27 }
  0x41   : > { %944 = vmatprep.subr.msk.bf16.mxu0 %vm1207_vm1, %v942_v30 }
  0x48   : > { %947 = vmatpush3.bf16.xpose.msk.msra.mxu0 %vm1207_vm1, %v942_v30 }
  0x49   : > { %950 = vmatprep.subr.msk.bf16.mxu0 %vm1207_vm1, %v948_v33 }
  0x50   : > { %953 = vmatpush3.bf16.xpose.msk.msra.mxu0 %vm1207_vm1, %v948_v33 }
  0x51   : > { %956 = vmatprep.subr.msk.bf16.mxu0 %vm1207_vm1, %v954_v36 }
  0x58   : > { %959 = vmatpush3.bf16.xpose.msk.msra.mxu0 %vm1207_vm1, %v954_v36 }
  0x5f   : > { %882 = vmatmul.mubr.msk.f32.vlgmr.msra.gmra.mrb[0].mxu0 %vm354_vm0, %v301_v37 }
  0x60   : > { %884 = vmatprep.mubr.msk.f32.mxu0 %vm354_vm0, %v302_v38 }
  0x63   : > { %885 = vmatmul.mubr.msk.f32.gmra.mrb[2].mxu0 %vm354_vm0, %v303_v39 }
  0x91   : > { %v337_v41 = vpop.permute.xlu0 %336 }
  0x92   : > { %v347_v42 = vpop.permute.xlu1 %346 }
  0x95   : > { %v342_v43 = vpop.permute.xlu0 %341 }
  0x96   : > { %v352_v49 = vpop.permute.xlu1 %351 }
  0x99   : > { %v507_v1 = vpop.permute.xlu0 %506 }
  0x9a   : > { %v512_v0 = vpop.permute.xlu1 %511 }
  0x9d   : > { %v517_v10 = vpop.permute.xlu0 %516 }
  0x9e   : > { %v522_v7 = vpop.permute.xlu1 %521 }
  0xa1   : > { %v629_v22 = vpop.permute.xlu0 %628 }
  0xa2   : > { %v634_v23 = vrot.slane %v629_v22, %v633_v21 }
 0x132   : > { %v883_v44 = vpop.f32.mrb[0].mxu0 }
 0x133   : > { %v487_v45 = vadd.f32 %v883_v44, %v342_v43  ;;  %v481_v46 = vpop.f32.mrb[1].mxu0 }
 0x134   : > { %v482_v47 = vadd.f32 %v481_v46, %v337_v41 }
 0x135   : > { %v501_v48 = vmax.f32 %v487_v45, 0.0 }
 0x136   : > { %v500_v50 = vmax.f32 %v482_v47, 0.0  ;;  %v886_v51 = vpop.f32.mrb[2].mxu0 }
 0x137   : > { %v497_v52 = vadd.f32 %v886_v51, %v352_v49  ;;  %v491_v53 = vpop.f32.mrb[3].mxu0 }
 0x138   : > { %v492_v54 = vadd.f32 %v491_v53, %v347_v42  ;;  %v960_v55 = vpack.c.bf16 %v501_v48, %v500_v50 }
 0x139   : > { %v503_v56 = vmax.f32 %v497_v52, 0.0 }
 0x13a   : > { %v502_v57 = vmax.f32 %v492_v54, 0.0  ;;  %961 = vmatprep.subr.bf16.mxu1 %v960_v55 }
 0x13b   : > { %963 = vmatpush3.bf16.msra.mxu1 %v960_v55 }
 0x13c   : > { %v964_v58 = vpack.c.bf16 %v503_v56, %v502_v57 }
 0x13e   : > { %965 = vmatprep.subr.bf16.mxu1 %v964_v58 }
 0x13f   : > { %967 = vmatpush3.bf16.msra.mxu1 %v964_v58 }
 0x140   : > { %968 = vmatprep.subr.bf16.mxu1 %v1088_v62 }
 0x142   : > { %896 = vmatmul.mubr.msk.f32.vlgmr.msra.gmra.mrb[0].mxu1 %vm524_vm2, %v305_v59 }
 0x143   : > { %898 = vmatprep.mubr.msk.f32.mxu1 %vm524_vm2, %v306_v60 }
 0x146   : > { %899 = vmatmul.mubr.msk.f32.gmra.mrb[2].mxu1 %vm524_vm2, %v307_v61 }
 0x147   : > { %909 = vmatprep.mubr.msk.f32.mxu1 %vm1089_vm3, %v1090_v63 }
 0x215   : > { %v897_v2 = vpop.f32.mrb[0].mxu1 }
 0x216   : > { %v609_v3 = vadd.f32 %v897_v2, %v512_v0  ;;  %v603_v4 = vpop.f32.mrb[1].mxu1 }
 0x217   : > { %v604_v5 = vadd.f32 %v603_v4, %v507_v1 }
 0x218   : > { %v623_v6 = vmax.f32 %v609_v3, 0.0 }
 0x219   : > { %v622_v8 = vmax.f32 %v604_v5, 0.0  ;;  %v900_v9 = vpop.f32.mrb[2].mxu1 }
 0x21a   : > { %v619_v11 = vadd.f32 %v900_v9, %v522_v7  ;;  %v613_v12 = vpop.f32.mrb[3].mxu1 }
 0x21b   : > { %v969_v13 = vpack.c.bf16 %v623_v6, %v622_v8  ;;  %v614_v14 = vadd.f32 %v613_v12, %v517_v10 }
 0x21c   : > { %v625_v15 = vmax.f32 %v619_v11, 0.0 }
 0x21d   : > { %v624_v16 = vmax.f32 %v614_v14, 0.0  ;;  %970 = vmatpush3.bf16.msra.mxu1 %v969_v13 }
 0x21e   : > { %971 = vmatprep.subr.bf16.mxu1 %v1088_v62 }
 0x21f   : > { %v972_v17 = vpack.c.bf16 %v625_v15, %v624_v16 }
 0x221   : > { %973 = vmatpush3.bf16.msra.mxu1 %v972_v17 }
 0x224   : > { %910 = vmatmul.mubr.msk.f32.vlgmr.msra.gmra.mrb[4].mxu1 %vm524_vm2, %v308_v18 }
 0x2f7   : > { %v704_v24 = vpop.f32.mrb[4].mxu1 }
 0x2f8   : > { %v705_v25 = vadd.f32 %v704_v24, %v634_v23  ;;  %v911_v26 = vpop.f32.mrb[5].mxu1 }
 0x2fa   : > { %v708_v27 = vsub.f32 0.0, %v705_v25 }
 0x2fc   : > { %v709_v28 = vmul.f32 1.442695, %v708_v27 }
 0x2fe   : > { %1019 = vpow2.f32 %v709_v28 }
 0x308   : > { %v1020_v29 = vpop.eup %1019 }
 0x309   : > { %v711_v30 = vadd.f32 1.0, %v1020_v29 }
 0x30b   : > { %1021 = vrcp.f32 %v711_v30 }
 0x315   : > { %v1022_v31 = vpop.eup %1021 }
 0x316   : > { %713 = vst [vmem:[%s285_s25] sm:$0x1] %v1022_v31 }
 0x317   : > { %1036 = shalt.err (!%p1033_p3)
}
 0x318   : > { %s1037_s14 = scalar_lea.hbm %s1308_s10, 16  ;;  %s1041_s22 = scalar_lea.hbm %s1357_s7, 32 }
 0x319   : > { %p1038_p4 = scmp.ne.s32.totalorder %s1308_s10, %s1037_s14  ;;  %p1042_p9 = scmp.lt.u32.totalorder %s1308_s10, %s1357_s7 }
 0x31a   : > { %p1043_p10 = scmp.lt.u32.totalorder %s1041_s22, %s1037_s14  ;;  %p1045_p12 = scmp.lt.u32.totalorder %s1037_s14, %s1308_s10 }
 0x31b   : > { %p1039_p7 = pnand %p1038_p4, %p1170_p5 }
 0x31c   : > { %p1044_p11 = por %p1043_p10, %p1042_p9 }
 0x31d   : > { %p1040_p8 = pneg %p1039_p7 }
 0x31e   : > { %p1046_p13 = por %p1045_p12, %p1044_p11 }
 0x320   : > { %p1047_p0 = pnand %p1046_p13, %p1040_p8 }
 0x322   : > { %1050 = shalt.err (!%p1047_p0)
}
 0x323   : > { %974 = dma.vmem_to_hbm [thread:$0]  (%p1170_p5), %s1310_s6, 16, %s1308_s10, %s715_s15  }
 0x324 PF: > { %p980_p1 = scmp.ge.s32.totalorder %s1085_s29, 2  ;;  %s739_s25 = sand.u32 1, %s1073_s26  }
 0x325   : > { %s740_s30 = scalar_lea.sflag [#allocation4], %s739_s25 }
 0x326   : > { %p977_p2 = pnand %p980_p1, %p1174_p6 }
 0x328   : > { %1068 = dma.done.wait (!%p977_p2), %s740_s30, 16  }
 0x329   : > { %1070 = vsyncadd (!%p977_p2), %s740_s30, 4294967280  ;;  %p19_p3 = scmp.ge.s32.totalorder %s1158_s8, 4   ;;  %s1362_s26 = smov %s1077_s27 }
 0x32a   : > { %s1363_s27 = smov %s1081_s28  ;;  %s1364_s28 = smov %s1168_s11 }
 0x32b   : > { %s1365_s29 = smov %s1158_s8  ;;  %21 = sbr.rel (!%p19_p3) target bundleno = 6 (0x6), region = 83 }
 0x332   :  { %744 = vsyncpa [#allocation4], 1 }
 0x333   :  { %746 = vsyncpa [#allocation4 + $0x1], 1 }

</bundles_post_ra>
